<compile_context>
chip_gen: v6e
topology: v6e:2x2x1
jax: 0.10.0
libtpu: 0.0.40
codegen_flags: <defaults>
</compile_context>

<pallas_src>
import jax
import jax.numpy as jnp
from jax.experimental import pallas as pl
from jax.experimental.pallas import tpu as pltpu


_LANE = 128
_TARGET_CHUNK_BYTES = 8 * 1024 * 1024  # ~8 MiB per DMA chunk


def _choose_layout(total_elems, itemsize):
    """Pick a lane-dense (rows, cols) view and a row-chunk size for the DMAs."""
    cols = None
    for cand in (8192, 4096, 2048, 1024, 512, 256, 128):
        if total_elems % cand == 0:
            cols = cand
            break
    if cols is None:
        # Odd element count: one contiguous whole-slab DMA (HBM->HBM, no VMEM
        # involved, so there is no OOM / masked-store hazard here).
        return 1, total_elems, 1
    rows = total_elems // cols
    target = max(1, _TARGET_CHUNK_BYTES // (cols * itemsize))
    if rows >= 2:
        # Guarantee >= 2 grid steps so both v7x TensorCores get work
        # (harmless on single-TC v5e/v6e).
        target = min(target, max(1, rows // 2))
    target = min(target, rows)
    # Largest divisor of rows <= target -> the last chunk is never partial.
    tile_rows = 1
    for t in range(target, 0, -1):
        if rows % t == 0:
            tile_rows = t
            break
    return rows, cols, tile_rows


def _make_dma_copy_kernel(tile_rows):
    def kernel(x_hbm, o_hbm, sem):
        # Identity forward: copy one row chunk HBM -> HBM per grid step.
        i = pl.program_id(0)
        start = i * tile_rows
        cp = pltpu.make_async_copy(
            x_hbm.at[pl.ds(start, tile_rows)],
            o_hbm.at[pl.ds(start, tile_rows)],
            sem,
        )
        cp.start()
        cp.wait()

    return kernel


def dummy_layer_norm(x, normalized_shape=None, eps=1e-5):
    """Pallas equivalent of DummyLayerNorm.forward (identity).

    normalized_shape / eps are accepted for API parity but unused, exactly as
    in the PyTorch module.  NOTE: the semantically optimal implementation is
    simply `return x`; the Pallas kernel below is a deliberate pass-through
    demonstration kept at the HBM copy roofline.
    """
    del normalized_shape, eps  # unused, just like the torch module
    orig_shape = x.shape
    total = int(x.size)
    if total == 0:
        return x

    rows, cols, tile_rows = _choose_layout(total, x.dtype.itemsize)
    x2d = x.reshape(rows, cols)  # metadata-only reshape (contiguous)

    out2d = pl.pallas_call(
        _make_dma_copy_kernel(tile_rows),
        out_shape=jax.ShapeDtypeStruct((rows, cols), x.dtype),
        grid=(rows // tile_rows,),
        in_specs=[pl.BlockSpec(memory_space=pl.ANY)],
        out_specs=pl.BlockSpec(memory_space=pl.ANY),
        scratch_shapes=[pltpu.SemaphoreType.DMA(())],
        compiler_params=pltpu.CompilerParams(
            dimension_semantics=("parallel",),
        ),
        cost_estimate=pl.CostEstimate(
            flops=0, transcendentals=0, bytes_accessed=2 * x.nbytes
        ),
    )(x2d)
    return out2d.reshape(orig_shape)


if __name__ == "__main__":
    key = jax.random.PRNGKey(0)

    # Primary small shape consistent with the transformer-style usage.
    batch, seq, hidden = 2, 8, 32
    x = jax.random.normal(key, (batch, seq, hidden), dtype=jnp.float32)
    out = jax.block_until_ready(dummy_layer_norm(x, normalized_shape=hidden, eps=1e-5))
    assert out.shape == x.shape and out.dtype == x.dtype
    assert bool(jnp.all(out == x))

    # Multi-chunk lane-dense path (grid of 2 DMA steps).
    x2 = jax.random.normal(jax.random.PRNGKey(0), (16, 128, 512), dtype=jnp.float32)
    out2 = jax.block_until_ready(dummy_layer_norm(x2, normalized_shape=512))
    assert out2.shape == x2.shape and out2.dtype == x2.dtype
    assert bool(jnp.all(out2 == x2))

    # Odd element count -> single whole-slab DMA fallback.
    x3 = jax.random.normal(jax.random.PRNGKey(0), (3, 7, 5), dtype=jnp.float32)
    out3 = jax.block_until_ready(dummy_layer_norm(x3, normalized_shape=5))
    assert out3.shape == x3.shape and bool(jnp.all(out3 == x3))

    # Sub-32-bit dtype path (bf16), still exact identity.
    x4 = jax.random.normal(jax.random.PRNGKey(0), (4, 64, 256), dtype=jnp.bfloat16)
    out4 = jax.block_until_ready(dummy_layer_norm(x4, normalized_shape=256))
    assert out4.shape == x4.shape and out4.dtype == x4.dtype
    assert bool(jnp.all(out4 == x4))

    print("KERNEL_OK")
</pallas_src>

<mosaic_0001>
module attributes {stable_mosaic.version = 11 : i64} {
  func.func @kernel(%arg0: i32, %arg1: memref<1x512xf32, #tpu.memory_space<any>>, %arg2: memref<1x512xf32, #tpu.memory_space<any>>, %arg3: memref<!tpu.dma_semaphore, #tpu.memory_space<semaphore_mem>>) attributes {dimension_semantics = [#tpu.dimension_semantics<parallel>], iteration_bounds = array<i64: 1>, scalar_prefetch = 0 : i64, scratch_operands = 1 : i64, tpu.core_type = #tpu.core_type<tc>, window_params = [{}, {}]} {
    %c1_i32 = arith.constant 1 : i32
    %0 = arith.muli %arg0, %c1_i32 : i32
    %c0_i32 = arith.constant 0 : i32
    %1 = tpu.memref_slice %arg1[%0, %c0_i32] : memref<1x512xf32, #tpu.memory_space<any>> -> memref<1x512xf32, #tpu.memory_space<any>>
    %c0_i32_0 = arith.constant 0 : i32
    %2 = tpu.memref_slice %arg2[%0, %c0_i32_0] : memref<1x512xf32, #tpu.memory_space<any>> -> memref<1x512xf32, #tpu.memory_space<any>>
    tpu.enqueue_dma source(%1 : memref<1x512xf32, #tpu.memory_space<any>>) target(%2 : memref<1x512xf32, #tpu.memory_space<any>>) target_semaphore(%arg3 : memref<!tpu.dma_semaphore, #tpu.memory_space<semaphore_mem>>)
    %c0_i32_1 = arith.constant 0 : i32
    %3 = tpu.memref_slice %arg1[%0, %c0_i32_1] : memref<1x512xf32, #tpu.memory_space<any>> -> memref<1x512xf32, #tpu.memory_space<any>>
    %c0_i32_2 = arith.constant 0 : i32
    %4 = tpu.memref_slice %arg2[%0, %c0_i32_2] : memref<1x512xf32, #tpu.memory_space<any>> -> memref<1x512xf32, #tpu.memory_space<any>>
    tpu.wait_dma2 semaphore(%arg3 : memref<!tpu.dma_semaphore, #tpu.memory_space<semaphore_mem>>) src(%3 : memref<1x512xf32, #tpu.memory_space<any>>) dst(%4 : memref<1x512xf32, #tpu.memory_space<any>>)
    return
  }
}

</mosaic_0001>

<bundles_post_ra>
// kernel: tpu_custom_call.1
= control target key start
LH: loop header
LB: loop body
LE: loop exit
PB: predicated region body
PF: predicated region fallthrough
CT: control target
= control target key end

     0   :  { %s33_s6 = smov [#allocation2]   ;;  %s34_s7 = smov 131072   ;;  %s52_s0 = inlined_call_operand.hbm [shape: f32[1,512], index: 0, kind: input, shape index: {}]   ;;  %s53_s1 = inlined_call_operand.hbm [shape: f32[1,512], index: 1, kind: output, shape index: {}]  }
   0x1   :  { %s35_s8 = smov 0  }
   0x2   :  { %17 = dma.general %s52_s0, 64, %s53_s1, %s33_s6, %s34_s7, [#allocation4], %s35_s8, 0  }
   0x3   :  { %31 = dma.done.wait [#allocation2], 64 }
   0x4   :  { %32 = vsyncadd [#allocation2], 4294967232 }
   0x5   :  { %21 = vsyncmov [#allocation2] }
   0x8   :  { %s22_s13 = vpop.sfrf %21 }
   0x9   :  { %p27_p0 = scmp.ne.s32.totalorder %s22_s13, 0 }
   0xb   :  { %26 = shalt.err (%p27_p0)  }

</bundles_post_ra>
